<compile_context>
chip_gen: v6e
topology: v6e:2x2x1
jax: 0.10.0
libtpu: 0.0.40
codegen_flags: <defaults>
</compile_context>

<pallas_src>
import functools

import jax
import jax.numpy as jnp
from jax.experimental import pallas as pl
from jax.experimental.pallas import tpu as pltpu

EPS = 1e-5  # PyTorch BatchNorm2d default eps


def _round_up(x, m):
    return ((x + m - 1) // m) * m


def _pick_tile(d, candidates):
    for c in candidates:
        if d % c == 0:
            return c
    return d


# ---------------------------------------------------------------------------
# Fused matmul kernel:  act((mean(x_slabs) @ W) * scale + bias [+ residual])
# ---------------------------------------------------------------------------
def _make_matmul_kernel(n_x, has_res, act):
    def kernel(*refs):
        x_refs = refs[:n_x]
        w_ref = refs[n_x]
        s_ref = refs[n_x + 1]
        b_ref = refs[n_x + 2]
        r_ref = refs[n_x + 3] if has_res else None
        o_ref = refs[-2]
        acc_ref = refs[-1]

        k = pl.program_id(2)

        @pl.when(k == 0)
        def _init():
            acc_ref[...] = jnp.zeros_like(acc_ref)

        if n_x == 1:
            xv = x_refs[0][...]
        else:
            # fused AvgPool2d(2) prologue over the 4 strided slabs (f32 average)
            tot = x_refs[0][...].astype(jnp.float32)
            for xr in x_refs[1:]:
                tot = tot + xr[...].astype(jnp.float32)
            xv = (tot * (1.0 / n_x)).astype(jnp.bfloat16)

        acc_ref[...] += jnp.dot(xv, w_ref[...], preferred_element_type=jnp.float32)

        @pl.when(k == pl.num_programs(2) - 1)
        def _finish():
            y = acc_ref[...] * s_ref[...] + b_ref[...]
            if has_res:
                y = y + r_ref[...].astype(jnp.float32)
            if act:
                y = jnp.maximum(y, 0.0)
            o_ref[...] = y.astype(o_ref.dtype)

    return kernel


def fused_matmul(x_slabs, w, scale, bias, *, act, residual=None,
                 out_dtype=jnp.bfloat16):
    """x_slabs: list of (M, K) arrays (len>1 => averaged first: fused avgpool).
    w: (K', N) bf16 (K' >= K, zero-padded rows), scale/bias: (N,) f32.
    residual: optional (M, N) array added before the activation.
    Returns (M, N_padded) in out_dtype (rows stripped, padded cols kept)."""
    M, K = x_slabs[0].shape
    N = w.shape[1]

    tm = _pick_tile(_round_up(M, 16), (512, 256, 128, 64, 32, 16))
    tn = _pick_tile(_round_up(N, 128), (256, 128))
    tk = _pick_tile(_round_up(K, 128), (512, 256, 128))
    Mp, Np, Kp = _round_up(M, tm), _round_up(N, tn), _round_up(K, tk)

    xs = [jnp.pad(x.astype(jnp.bfloat16), ((0, Mp - M), (0, Kp - K)))
          for x in x_slabs]
    wp = jnp.pad(w.astype(jnp.bfloat16), ((0, Kp - w.shape[0]), (0, Np - N)))
    sp = jnp.pad(scale.astype(jnp.float32), (0, Np - N)).reshape(1, Np)
    bp = jnp.pad(bias.astype(jnp.float32), (0, Np - N)).reshape(1, Np)

    n_x = len(xs)
    has_res = residual is not None
    operands = list(xs) + [wp, sp, bp]
    in_specs = [pl.BlockSpec((tm, tk), lambda i, j, k: (i, k)) for _ in range(n_x)]
    in_specs += [
        pl.BlockSpec((tk, tn), lambda i, j, k: (k, j)),
        pl.BlockSpec((1, tn), lambda i, j, k: (0, j)),
        pl.BlockSpec((1, tn), lambda i, j, k: (0, j)),
    ]
    if has_res:
        rp = jnp.pad(residual.astype(jnp.bfloat16),
                     ((0, Mp - residual.shape[0]), (0, Np - residual.shape[1])))
        operands.append(rp)
        in_specs.append(pl.BlockSpec((tm, tn), lambda i, j, k: (i, j)))

    out = pl.pallas_call(
        _make_matmul_kernel(n_x, has_res, act),
        out_shape=jax.ShapeDtypeStruct((Mp, Np), out_dtype),
        grid=(Mp // tm, Np // tn, Kp // tk),
        in_specs=in_specs,
        out_specs=pl.BlockSpec((tm, tn), lambda i, j, k: (i, j)),
        scratch_shapes=[pltpu.VMEM((tm, tn), jnp.float32)],
        compiler_params=pltpu.CompilerParams(
            dimension_semantics=("parallel", "parallel", "arbitrary"),
            vmem_limit_bytes=32 * 1024 * 1024),
    )(*operands)
    return out[:M]


# ---------------------------------------------------------------------------
# Standalone AvgPool2d(2) (only used once: the stem pool, which has 2 consumers)
# ---------------------------------------------------------------------------
def _avgpool_kernel(a_ref, b_ref, c_ref, d_ref, o_ref):
    s = (a_ref[...].astype(jnp.float32) + b_ref[...].astype(jnp.float32)
         + c_ref[...].astype(jnp.float32) + d_ref[...].astype(jnp.float32)) * 0.25
    o_ref[...] = s.astype(o_ref.dtype)


def avgpool2(x_nhwc):
    B, H, W, C = x_nhwc.shape
    Ho, Wo = H // 2, W // 2
    M = B * Ho * Wo
    slabs = [x_nhwc[:, i::2, j::2, :].reshape(M, C) for i in (0, 1) for j in (0, 1)]
    tm = _pick_tile(_round_up(M, 16), (256, 128, 64, 32, 16))
    Mp = _round_up(M, tm)
    slabs = [jnp.pad(s, ((0, Mp - M), (0, 0))) for s in slabs]
    y = pl.pallas_call(
        _avgpool_kernel,
        out_shape=jax.ShapeDtypeStruct((Mp, C), x_nhwc.dtype),
        grid=(Mp // tm,),
        in_specs=[pl.BlockSpec((tm, C), lambda i: (i, 0))] * 4,
        out_specs=pl.BlockSpec((tm, C), lambda i: (i, 0)),
        compiler_params=pltpu.CompilerParams(
            dimension_semantics=("parallel",),
            vmem_limit_bytes=32 * 1024 * 1024),
    )(*slabs)
    return y[:M].reshape(B, Ho, Wo, C)


# ---------------------------------------------------------------------------
# Attention-pool kernel: one grid step per batch element, all heads batched
# ---------------------------------------------------------------------------
def _attn_kernel(q_ref, k_ref, v_ref, o_ref, *, scale):
    q = q_ref[0].astype(jnp.float32)          # (nh, hd)
    k = k_ref[0].astype(jnp.float32)          # (nh, L, hd)
    v = v_ref[0].astype(jnp.float32)          # (nh, L, hd)
    s = jnp.sum(q[:, None, :] * k, axis=-1) * scale       # (nh, L)
    s = s - jnp.max(s, axis=-1, keepdims=True)
    p = jnp.exp(s)
    p = p * pl.reciprocal(jnp.sum(p, axis=-1, keepdims=True), approx=True)
    o_ref[0] = jnp.sum(p[:, :, None] * v, axis=1).astype(o_ref.dtype)   # (nh, hd)


# ---------------------------------------------------------------------------
# Parameter prep (done ONCE): fold BN, transpose + pad + bf16-cast weights
# ---------------------------------------------------------------------------
def prep_conv(w_oihw, bn, stride, padding, cin_pad=None):
    cout, cin, kh, kw = w_oihw.shape
    if cin_pad is None:
        cin_pad = _round_up(cin, 128)        # feature maps carry 128-padded channels
    cout_pad = _round_up(cout, 128)
    scale = bn["gamma"] / jnp.sqrt(bn["var"] + EPS)
    bias = bn["beta"] - bn["mean"] * scale
    w = jnp.transpose(w_oihw, (2, 3, 1, 0))                               # (kh,kw,cin,cout)
    w = jnp.pad(w, ((0, 0), (0, 0), (0, cin_pad - cin), (0, cout_pad - cout)))
    krows = kh * kw * cin_pad
    wmat = w.reshape(krows, cout_pad)
    wmat = jnp.pad(wmat, ((0, _round_up(krows, 128) - krows), (0, 0))).astype(jnp.bfloat16)
    return dict(
        w=wmat,
        scale=jnp.pad(scale, (0, cout_pad - cout)).astype(jnp.float32),
        bias=jnp.pad(bias, (0, cout_pad - cout)).astype(jnp.float32),
        kh=kh, kw=kw, stride=stride, padding=padding)


def prep_linear(lin):
    w = lin["w"]                               # (out, in)
    out_d, in_d = w.shape
    in_pad, out_pad = _round_up(in_d, 128), _round_up(out_d, 128)
    return dict(
        w=jnp.pad(w.T, ((0, in_pad - in_d), (0, out_pad - out_d))).astype(jnp.bfloat16),
        scale=jnp.ones((out_pad,), jnp.float32),
        bias=jnp.pad(lin["b"], (0, out_pad - out_d)).astype(jnp.float32),
        out=out_d)


def prepare_params(p):
    q = dict(
        # stem conv1 reads the raw 3-channel image: keep its K unpadded (9*3=27)
        conv1=prep_conv(p["conv1"], p["bn1"], stride=2, padding=1,
                        cin_pad=p["conv1"].shape[1]),
        conv2=prep_conv(p["conv2"], p["bn2"], stride=1, padding=1),
        conv3=prep_conv(p["conv3"], p["bn3"], stride=1, padding=1),
        heads=p["heads"],
    )
    for name in ("layer1", "layer2", "layer3", "layer4"):
        blocks = []
        for blk in p[name]:
            b = dict(
                stride=blk["stride"],
                conv1=prep_conv(blk["conv1"], blk["bn1"], 1, 0),
                conv2=prep_conv(blk["conv2"], blk["bn2"], 1, 1),
                conv3=prep_conv(blk["conv3"], blk["bn3"], 1, 0),
            )
            if "down_conv" in blk:
                b["down_conv"] = prep_conv(blk["down_conv"], blk["down_bn"], 1, 0)
            blocks.append(b)
        q[name] = blocks
    ap = p["attnpool"]
    q["attnpool"] = dict(
        pos=ap["pos"].astype(jnp.float32),
        embed_dim=ap["pos"].shape[1],
        q=prep_linear(ap["q"]), k=prep_linear(ap["k"]),
        v=prep_linear(ap["v"]), c=prep_linear(ap["c"]))
    return q


# ---------------------------------------------------------------------------
# Conv wrapper: im2col / strided-slab glue feeding the fused Pallas matmul
# ---------------------------------------------------------------------------
def conv_bn_act(x_nhwc, cp, act, residual_flat=None, pre_pool=False):
    B, H, W, Cin = x_nhwc.shape
    kh, kw, stride, padding = cp["kh"], cp["kw"], cp["stride"], cp["padding"]
    if pre_pool:
        # fused AvgPool2d(2) + 1x1 conv: the four strided slabs go straight to the kernel
        Ho, Wo = H // 2, W // 2
        slabs = [x_nhwc[:, i::2, j::2, :].reshape(B * Ho * Wo, Cin)
                 for i in (0, 1) for j in (0, 1)]
    elif kh == 1 and kw == 1:
        Ho, Wo = H, W
        slabs = [x_nhwc.reshape(B * H * W, Cin)]
    else:
        # TODO(synk): implicit GEMM (tap index as an extra 'arbitrary' grid axis) would
        # avoid materializing this bf16 im2col slab in HBM entirely.
        xp = jnp.pad(x_nhwc, ((0, 0), (padding, padding), (padding, padding), (0, 0)))
        Ho = (H + 2 * padding - kh) // stride + 1
        Wo = (W + 2 * padding - kw) // stride + 1
        cols = [xp[:, i:i + stride * Ho:stride, j:j + stride * Wo:stride, :]
                for i in range(kh) for j in range(kw)]
        slabs = [jnp.concatenate(cols, axis=-1).reshape(B * Ho * Wo, kh * kw * Cin)]
    y = fused_matmul(slabs, cp["w"], cp["scale"], cp["bias"], act=act,
                     residual=residual_flat)
    return y.reshape(B, Ho, Wo, y.shape[1])


# ---------------------------------------------------------------------------
# Parameter init (PyTorch-layout raw params, as before)
# ---------------------------------------------------------------------------
def init_conv(key, cin, cout, k):
    fan_in = cin * k * k
    return jax.random.normal(key, (cout, cin, k, k), jnp.float32) / jnp.sqrt(fan_in)


def init_bn(key, c):
    k1, k2, k3 = jax.random.split(key, 3)
    return dict(
        gamma=1.0 + 0.1 * jax.random.normal(k1, (c,), jnp.float32),
        beta=0.1 * jax.random.normal(k2, (c,), jnp.float32),
        mean=0.1 * jax.random.normal(k3, (c,), jnp.float32),
        var=jnp.ones((c,), jnp.float32),
    )


def init_linear(key, cin, cout):
    k1, k2 = jax.random.split(key)
    return dict(w=jax.random.normal(k1, (cout, cin), jnp.float32) / jnp.sqrt(cin),
                b=0.01 * jax.random.normal(k2, (cout,), jnp.float32))


def init_bottleneck(key, inplanes, planes, stride):
    ks = jax.random.split(key, 8)
    p = dict(
        conv1=init_conv(ks[0], inplanes, planes, 1), bn1=init_bn(ks[1], planes),
        conv2=init_conv(ks[2], planes, planes, 3), bn2=init_bn(ks[3], planes),
        conv3=init_conv(ks[4], planes, planes * 4, 1), bn3=init_bn(ks[5], planes * 4),
        stride=stride,
    )
    if stride > 1 or inplanes != planes * 4:
        p["down_conv"] = init_conv(ks[6], inplanes, planes * 4, 1)
        p["down_bn"] = init_bn(ks[7], planes * 4)
    return p


def init_params(key, layers, output_dim, heads, input_resolution, width):
    keys = iter(jax.random.split(key, 64))
    p = {}
    p["conv1"] = init_conv(next(keys), 3, width // 2, 3)
    p["bn1"] = init_bn(next(keys), width // 2)
    p["conv2"] = init_conv(next(keys), width // 2, width // 2, 3)
    p["bn2"] = init_bn(next(keys), width // 2)
    p["conv3"] = init_conv(next(keys), width // 2, width, 3)
    p["bn3"] = init_bn(next(keys), width)

    inplanes = [width]

    def make_layer(planes, blocks, stride):
        blk = [init_bottleneck(next(keys), inplanes[0], planes, stride)]
        inplanes[0] = planes * 4
        for _ in range(1, blocks):
            blk.append(init_bottleneck(next(keys), inplanes[0], planes, 1))
        return blk

    p["layer1"] = make_layer(width, layers[0], 1)
    p["layer2"] = make_layer(width * 2, layers[1], 2)
    p["layer3"] = make_layer(width * 4, layers[2], 2)
    p["layer4"] = make_layer(width * 8, layers[3], 2)

    embed_dim = width * 32
    spacial = input_resolution // 32
    p["attnpool"] = dict(
        pos=jax.random.normal(next(keys), (spacial ** 2 + 1, embed_dim),
                              jnp.float32) / (embed_dim ** 0.5),
        q=init_linear(next(keys), embed_dim, embed_dim),
        k=init_linear(next(keys), embed_dim, embed_dim),
        v=init_linear(next(keys), embed_dim, embed_dim),
        c=init_linear(next(keys), embed_dim, output_dim),
    )
    p["heads"] = heads
    return p


# ---------------------------------------------------------------------------
# Forward pass
# ---------------------------------------------------------------------------
def bottleneck_forward(x, p):
    stride = p["stride"]
    out = conv_bn_act(x, p["conv1"], act=True)                       # 1x1 + BN + ReLU
    out = conv_bn_act(out, p["conv2"], act=True)                     # 3x3 + BN + ReLU
    if "down_conv" in p:
        # identity path: (AvgPool2d(stride) fused) + 1x1 conv + BN
        identity = conv_bn_act(x, p["down_conv"], act=False, pre_pool=(stride > 1))
    else:
        identity = x
    Bi, Hi, Wi, Ci = identity.shape
    res_flat = identity.reshape(Bi * Hi * Wi, Ci)
    # conv3 fuses: (optional AvgPool2d(2)) + 1x1 conv + BN + residual add + ReLU
    return conv_bn_act(out, p["conv3"], act=True, residual_flat=res_flat,
                       pre_pool=(stride > 1))


def attention_pool(x_nhwc, ap, num_heads):
    B, H, W, Cp = x_nhwc.shape
    E = ap["embed_dim"]
    hd = E // num_heads
    # flatten(start_dim=2).permute(2,0,1) on NCHW == this on NHWC (strip channel pad)
    x = x_nhwc.reshape(B, H * W, Cp)[:, :, :E].astype(jnp.float32)    # (B, HW, E)
    x = jnp.transpose(x, (1, 0, 2))                                   # (HW, B, E)
    x = jnp.concatenate([x.mean(axis=0, keepdims=True), x], axis=0)   # (L, B, E)
    x = x + ap["pos"][:, None, :]
    L = x.shape[0]

    q = fused_matmul([x[0]], ap["q"]["w"], ap["q"]["scale"], ap["q"]["bias"],
                     act=False, out_dtype=jnp.float32)[:, :E]         # (B, E)
    kv_in = x.reshape(L * B, E)
    k = fused_matmul([kv_in], ap["k"]["w"], ap["k"]["scale"], ap["k"]["bias"],
                     act=False, out_dtype=jnp.float32)[:, :E]         # (L*B, E)
    v = fused_matmul([kv_in], ap["v"]["w"], ap["v"]["scale"], ap["v"]["bias"],
                     act=False, out_dtype=jnp.float32)[:, :E]

    qh = q.reshape(B, num_heads, hd)
    kh = k.reshape(L, B, num_heads, hd).transpose(1, 2, 0, 3)         # (B, nh, L, hd)
    vh = v.reshape(L, B, num_heads, hd).transpose(1, 2, 0, 3)

    o = pl.pallas_call(
        functools.partial(_attn_kernel, scale=float(hd) ** -0.5),
        out_shape=jax.ShapeDtypeStruct((B, num_heads, hd), jnp.float32),
        grid=(B,),
        in_specs=[
            pl.BlockSpec((1, num_heads, hd), lambda b: (b, 0, 0)),
            pl.BlockSpec((1, num_heads, L, hd), lambda b: (b, 0, 0, 0)),
            pl.BlockSpec((1, num_heads, L, hd), lambda b: (b, 0, 0, 0)),
        ],
        out_specs=pl.BlockSpec((1, num_heads, hd), lambda b: (b, 0, 0)),
        compiler_params=pltpu.CompilerParams(
            dimension_semantics=("parallel",),
            vmem_limit_bytes=32 * 1024 * 1024),
    )(qh, kh, vh)
    o = o.reshape(B, E)

    out = fused_matmul([o], ap["c"]["w"], ap["c"]["scale"], ap["c"]["bias"],
                       act=False, out_dtype=jnp.float32)
    return out[:, :ap["c"]["out"]]                                    # (B, output_dim)


def modified_resnet_forward(x_nchw, pp):
    x = jnp.transpose(x_nchw, (0, 2, 3, 1)).astype(jnp.bfloat16)      # NCHW -> NHWC
    # stem
    x = conv_bn_act(x, pp["conv1"], act=True)
    x = conv_bn_act(x, pp["conv2"], act=True)
    x = conv_bn_act(x, pp["conv3"], act=True)
    x = avgpool2(x)
    for name in ("layer1", "layer2", "layer3", "layer4"):
        for blk in pp[name]:
            x = bottleneck_forward(x, blk)
    return attention_pool(x, pp["attnpool"], pp["heads"])


# ---------------------------------------------------------------------------
if __name__ == "__main__":
    key = jax.random.PRNGKey(0)
    kparams, kx = jax.random.split(key)

    layers = (1, 1, 1, 1)        # one Bottleneck per stage (small synthetic config)
    output_dim = 32
    heads = 4
    input_resolution = 32        # must be divisible by 32 (final spatial = 1)
    width = 8

    raw_params = init_params(kparams, layers, output_dim, heads, input_resolution, width)
    params = prepare_params(raw_params)   # fold BN + transpose/pad/bf16 weights once
    x = jax.random.normal(kx, (2, 3, input_resolution, input_resolution), jnp.float32)

    out = modified_resnet_forward(x, params)
    out = jax.block_until_ready(out)

    assert out.shape == (2, output_dim), out.shape
    assert bool(jnp.all(jnp.isfinite(out)))
    print("KERNEL_OK")
</pallas_src>

<mosaic_0001>
module attributes {stable_mosaic.version = 11 : i64} {
  func.func @kernel(%arg0: i32, %arg1: i32, %arg2: i32, %arg3: memref<512x128xbf16, #tpu.memory_space<vmem>>, %arg4: memref<128x128xbf16, #tpu.memory_space<vmem>>, %arg5: memref<1x128xf32, #tpu.memory_space<vmem>>, %arg6: memref<1x128xf32, #tpu.memory_space<vmem>>, %arg7: memref<512x128xbf16, #tpu.memory_space<vmem>>, %arg8: memref<512x128xf32, #tpu.memory_space<vmem>>) attributes {dimension_semantics = [#tpu.dimension_semantics<parallel>, #tpu.dimension_semantics<parallel>, #tpu.dimension_semantics<arbitrary>], iteration_bounds = array<i64: 1, 1, 1>, scalar_prefetch = 0 : i64, scratch_operands = 1 : i64, tpu.core_type = #tpu.core_type<tc>, window_params = [{transform_indices = @transform_0, window_bounds = array<i64: 512, 128>}, {transform_indices = @transform_1, window_bounds = array<i64: 128, 128>}, {transform_indices = @transform_2, window_bounds = array<i64: 1, 128>}, {transform_indices = @transform_3, window_bounds = array<i64: 1, 128>}, {transform_indices = @transform_4, window_bounds = array<i64: 512, 128>}]} {
    %c0_i32 = arith.constant 0 : i32
    %0 = arith.cmpi eq, %arg2, %c0_i32 : i32
    %1 = arith.extui %0 : i1 to i32
    %c0_i32_0 = arith.constant 0 : i32
    %2 = arith.cmpi ne, %1, %c0_i32_0 : i32
    scf.if %2 {
      %cst_10 = arith.constant 0.000000e+00 : f32
      %12 = vector.broadcast %cst_10 : f32 to vector<512x128xf32>
      %c0_11 = arith.constant 0 : index
      %c0_12 = arith.constant 0 : index
      %13 = vector.load %arg8[%c0_11, %c0_12] : memref<512x128xf32, #tpu.memory_space<vmem>>, vector<512x128xf32>
      tpu.vector_store %arg8[%c0_11, %c0_12], %12 {strides = array<i32>} : memref<512x128xf32, #tpu.memory_space<vmem>>, vector<512x128xf32>,
    } else {
    }
    %c0 = arith.constant 0 : index
    %c0_1 = arith.constant 0 : index
    %3 = vector.load %arg3[%c0, %c0_1] : memref<512x128xbf16, #tpu.memory_space<vmem>>, vector<512x128xbf16>
    %c0_2 = arith.constant 0 : index
    %c0_3 = arith.constant 0 : index
    %4 = vector.load %arg8[%c0_2, %c0_3] : memref<512x128xf32, #tpu.memory_space<vmem>>, vector<512x128xf32>
    %c0_4 = arith.constant 0 : index
    %c0_5 = arith.constant 0 : index
    %5 = vector.load %arg4[%c0_4, %c0_5] : memref<128x128xbf16, #tpu.memory_space<vmem>>, vector<128x128xbf16>
    %cst = arith.constant dense<0.000000e+00> : vector<512x128xf32>
    %6 = tpu.matmul %3, %5, %cst {dimension_numbers = #tpu.dot_dimension_numbers<[1], [0], [0], [1], [0, 0, 1, 1], [], []>} : vector<512x128xbf16>, vector<128x128xbf16>, vector<512x128xf32> -> vector<512x128xf32>
    %7 = arith.addf %4, %6 : vector<512x128xf32>
    %c0_6 = arith.constant 0 : index
    %c0_7 = arith.constant 0 : index
    %8 = vector.load %arg8[%c0_6, %c0_7] : memref<512x128xf32, #tpu.memory_space<vmem>>, vector<512x128xf32>
    tpu.vector_store %arg8[%c0_6, %c0_7], %7 {strides = array<i32>} : memref<512x128xf32, #tpu.memory_space<vmem>>, vector<512x128xf32>,
    %c0_i32_8 = arith.constant 0 : i32
    %9 = arith.cmpi eq, %arg2, %c0_i32_8 : i32
    %10 = arith.extui %9 : i1 to i32
    %c0_i32_9 = arith.constant 0 : i32
    %11 = arith.cmpi ne, %10, %c0_i32_9 : i32
    scf.if %11 {
      %c0_10 = arith.constant 0 : index
      %c0_11 = arith.constant 0 : index
      %12 = vector.load %arg8[%c0_10, %c0_11] : memref<512x128xf32, #tpu.memory_space<vmem>>, vector<512x128xf32>
      %c0_12 = arith.constant 0 : index
      %c0_13 = arith.constant 0 : index
      %13 = vector.load %arg5[%c0_12, %c0_13] : memref<1x128xf32, #tpu.memory_space<vmem>>, vector<1x128xf32>
      %14 = vector.broadcast %13 : vector<1x128xf32> to vector<512x128xf32>
      %15 = arith.mulf %12, %14 : vector<512x128xf32>
      %c0_14 = arith.constant 0 : index
      %c0_15 = arith.constant 0 : index
      %16 = vector.load %arg6[%c0_14, %c0_15] : memref<1x128xf32, #tpu.memory_space<vmem>>, vector<1x128xf32>
      %17 = vector.broadcast %16 : vector<1x128xf32> to vector<512x128xf32>
      %18 = arith.addf %15, %17 : vector<512x128xf32>
      %cst_16 = arith.constant 0.000000e+00 : f32
      %19 = vector.broadcast %cst_16 : f32 to vector<512x128xf32>
      %20 = arith.maximumf %18, %19 : vector<512x128xf32>
      %21 = arith.truncf %20 : vector<512x128xf32> to vector<512x128xbf16>
      %c0_17 = arith.constant 0 : index
      %c0_18 = arith.constant 0 : index
      %22 = vector.load %arg7[%c0_17, %c0_18] : memref<512x128xbf16, #tpu.memory_space<vmem>>, vector<512x128xbf16>
      tpu.vector_store %arg7[%c0_17, %c0_18], %21 {strides = array<i32>} : memref<512x128xbf16, #tpu.memory_space<vmem>>, vector<512x128xbf16>,
    } else {
    }
    return
  }
  func.func @transform_0(%arg0: i32, %arg1: i32, %arg2: i32) -> (i32, i32) {
    %c0_i32 = arith.constant 0 : i32
    return %arg0, %arg2 : i32, i32
  }
  func.func @transform_1(%arg0: i32, %arg1: i32, %arg2: i32) -> (i32, i32) {
    %c0_i32 = arith.constant 0 : i32
    return %arg2, %arg1 : i32, i32
  }
  func.func @transform_2(%arg0: i32, %arg1: i32, %arg2: i32) -> (i32, i32) {
    %c0_i32 = arith.constant 0 : i32
    %c0_i32_0 = arith.constant 0 : i32
    return %c0_i32, %arg1 : i32, i32
  }
  func.func @transform_3(%arg0: i32, %arg1: i32, %arg2: i32) -> (i32, i32) {
    %c0_i32 = arith.constant 0 : i32
    %c0_i32_0 = arith.constant 0 : i32
    return %c0_i32, %arg1 : i32, i32
  }
  func.func @transform_4(%arg0: i32, %arg1: i32, %arg2: i32) -> (i32, i32) {
    %c0_i32 = arith.constant 0 : i32
    return %arg0, %arg1 : i32, i32
  }
}

</mosaic_0001>

<bundles_post_ra>
// kernel: tpu_custom_call.1
= control target key start
LH: loop header
LB: loop body
LE: loop exit
PB: predicated region body
PF: predicated region fallthrough
CT: control target
= control target key end

     0   :  { %9 = vsyncpa [#allocation4], 0  ;;  %s2321_s0 = inlined_call_operand.hbm [shape: bf16[512,128], index: 0, kind: input, shape index: {}]   ;;  %s2322_s1 = inlined_call_operand.hbm [shape: bf16[128,128], index: 1, kind: input, shape index: {}]   ;;  %s2323_s2 = inlined_call_operand.vmem [shape: f32[1,128], index: 2, kind: input, shape index: {}]   ;;  %s2324_s3 = inlined_call_operand.vmem [shape: f32[1,128], index: 3, kind: input, shape index: {}]   ;;  %s2325_s4 = inlined_call_operand.hbm [shape: bf16[512,128], index: 4, kind: output, shape index: {}]  }
   0x1   :  { %10 = vsyncpa [#allocation7], 0 }
   0x2   :  { %11 = vsyncpa [#allocation5], 0  ;;  %s2135_s15 = smov [#allocation3]  }
   0x3   :  { %s17_s16 = sshll.u32 %s2135_s15, 4  ;;  %s18_s16 = int_to_ptr.vmem [resolvable:$true] %s17_s16 }
   0x4   :  { %s2077_s17 = scalar_lea.vmem %s18_s16, 4096  ;;  %p2082_p1 = scmp.lt.s32.totalorder %s18_s16, %s18_s16 }
   0x5   :  { %p2078_p0 = scmp.ne.s32.totalorder %s18_s16, %s2077_s17  ;;  %p2083_p2 = scmp.lt.s32.totalorder %s2077_s17, %s2077_s17 }
   0x7   :  { %p2084_p3 = por %p2083_p2, %p2082_p1 }
   0x9   :  { %p2085_p4 = pnand %p2084_p3, %p2078_p0 }
   0xb   :  { %2088 = shalt.err (!%p2085_p4)
}
   0xc   :  { %s2136_s18 = smov 64   ;;  %s2137_s19 = smov 4  }
   0xd   :  { %23 = dma.hbm_to_vmem [thread:$0]  %s2321_s0, 4096, %s18_s16, [#allocation4], %s2136_s18, %s2136_s18, %s2137_s19  }
   0xe   :  { %s2138_s22 = smov [#allocation6]  }
   0xf   :  { %s29_s23 = sshll.u32 %s2138_s22, 4  ;;  %s30_s23 = int_to_ptr.vmem [resolvable:$true] %s29_s23 }
  0x10   :  { %s2097_s24 = scalar_lea.vmem %s30_s23, 1024  ;;  %p2102_p6 = scmp.lt.s32.totalorder %s30_s23, %s30_s23 }
  0x11   :  { %p2098_p5 = scmp.ne.s32.totalorder %s30_s23, %s2097_s24  ;;  %p2103_p7 = scmp.lt.s32.totalorder %s2097_s24, %s2097_s24 }
  0x13   :  { %p2104_p8 = por %p2103_p7, %p2102_p6 }
  0x15   :  { %p2105_p9 = pnand %p2104_p8, %p2098_p5 }
  0x17   :  { %2108 = shalt.err (!%p2105_p9)
}
  0x18   :  { %35 = dma.hbm_to_vmem [thread:$0]  %s2322_s1, 1024, %s30_s23, [#allocation7], %s2136_s18, %s2136_s18, %s2137_s19  }
  0x19   :  { %2129 = dma.done.wait [#allocation4], 4096  }
  0x1a   :  { %2130 = vsyncadd [#allocation4], 4294963200 }
  0x1b   :  { %2131 = dma.done.wait [#allocation7], 1024  }
  0x1c   :  { %2132 = vsyncadd [#allocation7], 4294966272  ;;  %v2029_v0 = vld [vmem:[#allocation6 + $0x38] sm:$0xff]   ;;  %v2030_v1 = vld [vmem:[#allocation6 + $0x30] sm:$0xff]  }
  0x1d   :  { %1928 = vmatprep.subr.bf16.mxu0 %v2029_v0  ;;  %2008 = vmatprep.subr.bf16.mxu1 %v2029_v0  ;;  %v2031_v2 = vld [vmem:[#allocation6 + $0x28] sm:$0xff]   ;;  %v2032_v3 = vld [vmem:[#allocation6 + $0x20] sm:$0xff]   ;;  %v2033_v6 = vld [vmem:[#allocation6 + $0x18] sm:$0xff]  }
  0x1e   :  { %1929 = vmatpush3.bf16.msra.mxu0 %v2029_v0  ;;  %2016 = vmatpush3.bf16.msra.mxu1 %v2029_v0  ;;  %v2037_v4 = vld [vmem:[#allocation3] sm:$0xff]   ;;  %v2034_v7 = vld [vmem:[#allocation6 + $0x10] sm:$0xff]   ;;  %v2035_v8 = vld [vmem:[#allocation6 + $0x8] sm:$0xff]  }
  0x1f   :  { %1930 = vmatprep.subr.bf16.mxu0 %v2030_v1  ;;  %2009 = vmatprep.subr.bf16.mxu1 %v2030_v1  ;;  %v2038_v5 = vld [vmem:[#allocation3 + $0x80] sm:$0xff]   ;;  %v2039_v10 = vld [vmem:[#allocation3 + $0x8] sm:$0xff]   ;;  %v2041_v12 = vld [vmem:[#allocation3 + $0x10] sm:$0xff]  }
  0x20   :  { %1944 = vmatprep.mubr.bf16.mxu0 %v2037_v4  ;;  %1976 = vmatprep.mubr.bf16.mxu1 %v2038_v5  ;;  %v2036_v9 = vld [vmem:[#allocation6] sm:$0xff]   ;;  %v2040_v11 = vld [vmem:[#allocation3 + $0x88] sm:$0xff]   ;;  %v2042_v13 = vld [vmem:[#allocation3 + $0x90] sm:$0xff]  }
  0x21   :  { %v2043_v14 = vld [vmem:[#allocation3 + $0x18] sm:$0xff]   ;;  %v2045_v16 = vld [vmem:[#allocation3 + $0x20] sm:$0xff]   ;;  %v2047_v18 = vld [vmem:[#allocation3 + $0x28] sm:$0xff]  }
  0x22   :  { %1931 = vmatpush3.bf16.msra.mxu0 %v2030_v1  ;;  %2017 = vmatpush3.bf16.msra.mxu1 %v2030_v1  ;;  %v2044_v15 = vld [vmem:[#allocation3 + $0x98] sm:$0xff]   ;;  %v2046_v17 = vld [vmem:[#allocation3 + $0xa0] sm:$0xff]   ;;  %v2048_v19 = vld [vmem:[#allocation3 + $0xa8] sm:$0xff]  }
  0x23   :  { %1932 = vmatprep.subr.bf16.mxu0 %v2031_v2  ;;  %2010 = vmatprep.subr.bf16.mxu1 %v2031_v2  ;;  %v2049_v20 = vld [vmem:[#allocation3 + $0x30] sm:$0xff]   ;;  %v2051_v22 = vld [vmem:[#allocation3 + $0x38] sm:$0xff]   ;;  %v2053_v24 = vld [vmem:[#allocation3 + $0x40] sm:$0xff]  }
  0x24   :  { %v2050_v21 = vld [vmem:[#allocation3 + $0xb0] sm:$0xff]   ;;  %v2052_v23 = vld [vmem:[#allocation3 + $0xb8] sm:$0xff]   ;;  %v2054_v25 = vld [vmem:[#allocation3 + $0xc0] sm:$0xff]  }
  0x25   :  { %v2055_v26 = vld [vmem:[#allocation3 + $0x48] sm:$0xff]   ;;  %v2057_v28 = vld [vmem:[#allocation3 + $0x50] sm:$0xff]   ;;  %v2059_v30 = vld [vmem:[#allocation3 + $0x58] sm:$0xff]  }
  0x26   :  { %1933 = vmatpush3.bf16.msra.mxu0 %v2031_v2  ;;  %2018 = vmatpush3.bf16.msra.mxu1 %v2031_v2  ;;  %v2056_v27 = vld [vmem:[#allocation3 + $0xc8] sm:$0xff]   ;;  %v2058_v29 = vld [vmem:[#allocation3 + $0xd0] sm:$0xff]   ;;  %v2060_v31 = vld [vmem:[#allocation3 + $0xd8] sm:$0xff]  }
  0x27   :  { %1934 = vmatprep.subr.bf16.mxu0 %v2032_v3  ;;  %2011 = vmatprep.subr.bf16.mxu1 %v2032_v3  ;;  %v2061_v32 = vld [vmem:[#allocation3 + $0x60] sm:$0xff]   ;;  %v2063_v34 = vld [vmem:[#allocation3 + $0x68] sm:$0xff]   ;;  %v2065_v36 = vld [vmem:[#allocation3 + $0x70] sm:$0xff]  }
  0x28   :  { %v2062_v33 = vld [vmem:[#allocation3 + $0xe0] sm:$0xff]   ;;  %v2064_v35 = vld [vmem:[#allocation3 + $0xe8] sm:$0xff]   ;;  %v2066_v37 = vld [vmem:[#allocation3 + $0xf0] sm:$0xff]  }
  0x29   :  { %v2067_v38 = vld [vmem:[#allocation3 + $0x78] sm:$0xff]   ;;  %v2180_v40 = vld [vmem:[%s2323_s2] ss:$0 sm:$0xff]  ;;  %s2139_s2 = smov [#allocation8]  }
  0x2a   :  { %1935 = vmatpush3.bf16.msra.mxu0 %v2032_v3  ;;  %2019 = vmatpush3.bf16.msra.mxu1 %v2032_v3  ;;  %v2068_v39 = vld [vmem:[#allocation3 + $0xf8] sm:$0xff]   ;;  %v2187_v45 = vld [vmem:[%s2324_s3] ss:$0 sm:$0xff]  ;;  %s1514_s3 = sshll.u32 %s2139_s2, 4  ;;  %s1515_s3 = int_to_ptr.vmem [resolvable:$true] %s1514_s3 }
  0x2b   :  { %1936 = vmatprep.subr.bf16.mxu0 %v2033_v6  ;;  %2012 = vmatprep.subr.bf16.mxu1 %v2033_v6  ;;  %s2109_s29 = scalar_lea.vmem %s1515_s3, 4096  ;;  %p2114_p11 = scmp.lt.s32.totalorder %s1515_s3, %s1515_s3 }
  0x2c   :  { %p2110_p10 = scmp.ne.s32.totalorder %s1515_s3, %s2109_s29  ;;  %p2115_p12 = scmp.lt.s32.totalorder %s2109_s29, %s2109_s29 }
  0x2e   :  { %1937 = vmatpush3.bf16.msra.mxu0 %v2033_v6  ;;  %2020 = vmatpush3.bf16.msra.mxu1 %v2033_v6  ;;  %p2116_p13 = por %p2115_p12, %p2114_p11 }
  0x2f   :  { %1938 = vmatprep.subr.bf16.mxu0 %v2034_v7  ;;  %2013 = vmatprep.subr.bf16.mxu1 %v2034_v7 }
  0x30   :  { %p2117_p0 = pnand %p2116_p13, %p2110_p10 }
  0x32   :  { %1939 = vmatpush3.bf16.msra.mxu0 %v2034_v7  ;;  %2021 = vmatpush3.bf16.msra.mxu1 %v2034_v7 }
  0x33   :  { %1940 = vmatprep.subr.bf16.mxu0 %v2035_v8  ;;  %2014 = vmatprep.subr.bf16.mxu1 %v2035_v8 }
  0x36   :  { %1941 = vmatpush3.bf16.msra.mxu0 %v2035_v8  ;;  %2022 = vmatpush3.bf16.msra.mxu1 %v2035_v8 }
  0x37   :  { %1942 = vmatprep.subr.bf16.mxu0 %v2036_v9  ;;  %2015 = vmatprep.subr.bf16.mxu1 %v2036_v9 }
  0x3a   :  { %1943 = vmatpush3.bf16.msra.mxu0 %v2036_v9  ;;  %2023 = vmatpush3.bf16.msra.mxu1 %v2036_v9 }
  0x3d   :  { %1945 = vmatmul.mubr.bf16.vlgmr.msra.gmra.mxu0 %v2039_v10  ;;  %1977 = vmatmul.mubr.bf16.vlgmr.msra.gmra.mxu1 %v2040_v11 }
  0x3e   :  { %1948 = vmatprep.mubr.bf16.mxu0 %v2041_v12  ;;  %1980 = vmatprep.mubr.bf16.mxu1 %v2042_v13 }
  0x45   :  { %1949 = vmatmul.mubr.bf16.gmra.mxu0 %v2043_v14  ;;  %1981 = vmatmul.mubr.bf16.gmra.mxu1 %v2044_v15 }
  0x46   :  { %1952 = vmatprep.mubr.bf16.mxu0 %v2045_v16  ;;  %1984 = vmatprep.mubr.bf16.mxu1 %v2046_v17 }
  0x4d   :  { %1953 = vmatmul.mubr.bf16.gmra.mxu0 %v2047_v18  ;;  %1985 = vmatmul.mubr.bf16.gmra.mxu1 %v2048_v19 }
  0x4e   :  { %1956 = vmatprep.mubr.bf16.mxu0 %v2049_v20  ;;  %1988 = vmatprep.mubr.bf16.mxu1 %v2050_v21 }
  0x55   :  { %1957 = vmatmul.mubr.bf16.gmra.mxu0 %v2051_v22  ;;  %1989 = vmatmul.mubr.bf16.gmra.mxu1 %v2052_v23 }
  0x56   :  { %1960 = vmatprep.mubr.bf16.mxu0 %v2053_v24  ;;  %1992 = vmatprep.mubr.bf16.mxu1 %v2054_v25 }
  0x5d   :  { %1961 = vmatmul.mubr.bf16.gmra.mxu0 %v2055_v26  ;;  %1993 = vmatmul.mubr.bf16.gmra.mxu1 %v2056_v27 }
  0x5e   :  { %1964 = vmatprep.mubr.bf16.mxu0 %v2057_v28  ;;  %1996 = vmatprep.mubr.bf16.mxu1 %v2058_v29 }
  0x65   :  { %1965 = vmatmul.mubr.bf16.gmra.mxu0 %v2059_v30  ;;  %1997 = vmatmul.mubr.bf16.gmra.mxu1 %v2060_v31 }
  0x66   :  { %1968 = vmatprep.mubr.bf16.mxu0 %v2061_v32  ;;  %2000 = vmatprep.mubr.bf16.mxu1 %v2062_v33 }
  0x6d   :  { %1969 = vmatmul.mubr.bf16.gmra.mxu0 %v2063_v34  ;;  %2001 = vmatmul.mubr.bf16.gmra.mxu1 %v2064_v35 }
  0x6e   :  { %1972 = vmatprep.mubr.bf16.mxu0 %v2065_v36  ;;  %2004 = vmatprep.mubr.bf16.mxu1 %v2066_v37 }
  0x75   :  { %1973 = vmatmul.mubr.bf16.gmra.mxu0 %v2067_v38  ;;  %2005 = vmatmul.mubr.bf16.gmra.mxu1 %v2068_v39 }
  0xfd   :  { %v1946_v41 = vpop.f32.mrf.mxu0  ;;  %v1978_v42 = vpop.f32.mrf.mxu1 }
  0xfe   :  { %v992_v43 = vmul.f32 %v1946_v41, %v2180_v40  ;;  %v1024_v44 = vmul.f32 %v1978_v42, %v2180_v40 }
  0xff   :  { %v533_v46 = vpop.f32.mrf.mxu0  ;;  %v661_v47 = vpop.f32.mrf.mxu1 }
 0x100   :  { %v990_v48 = vmul.f32 %v2180_v40, %v533_v46  ;;  %v1022_v49 = vmul.f32 %v2180_v40, %v661_v47  ;;  %v1063_v52 = vadd.f32 %v2187_v45, %v992_v43  ;;  %v1095_v53 = vadd.f32 %v2187_v45, %v1024_v44 }
 0x101   :  { %v1947_v50 = vpop.f32.mrf.mxu0  ;;  %v1979_v51 = vpop.f32.mrf.mxu1 }
 0x102   :  { %v993_v54 = vmul.f32 %v1947_v50, %v2180_v40  ;;  %v1025_v55 = vmul.f32 %v1979_v51, %v2180_v40  ;;  %v1061_v58 = vadd.f32 %v2187_v45, %v990_v48  ;;  %v1093_v59 = vadd.f32 %v2187_v45, %v1022_v49 }
 0x103   :  { %v536_v56 = vpop.f32.mrf.mxu0  ;;  %v664_v57 = vpop.f32.mrf.mxu1  ;;  %v1127_v2 = vmax.f32 %v1063_v52, 0.0  ;;  %v1159_v3 = vmax.f32 %v1095_v53, 0.0 }
 0x104   :  { %v991_v60 = vmul.f32 %v2180_v40, %v536_v56  ;;  %v1023_v61 = vmul.f32 %v2180_v40, %v664_v57  ;;  %v1064_v62 = vadd.f32 %v2187_v45, %v993_v54  ;;  %v1096_v63 = vadd.f32 %v2187_v45, %v1025_v55 }
 0x105   :  { %v1950_v0 = vpop.f32.mrf.mxu0  ;;  %v1982_v1 = vpop.f32.mrf.mxu1  ;;  %v1125_v12 = vmax.f32 %v1061_v58, 0.0  ;;  %v1157_v13 = vmax.f32 %v1093_v59, 0.0 }
 0x106   :  { %v1062_v4 = vadd.f32 %v2187_v45, %v991_v60  ;;  %v1094_v5 = vadd.f32 %v2187_v45, %v1023_v61  ;;  %v1128_v6 = vmax.f32 %v1064_v62, 0.0  ;;  %v1160_v7 = vmax.f32 %v1096_v63, 0.0 }
 0x107   :  { %v996_v8 = vmul.f32 %v1950_v0, %v2180_v40  ;;  %v1028_v9 = vmul.f32 %v1982_v1, %v2180_v40  ;;  %v549_v10 = vpop.f32.mrf.mxu0  ;;  %v677_v11 = vpop.f32.mrf.mxu1 }
 0x108   :  { %v1126_v14 = vmax.f32 %v1062_v4, 0.0  ;;  %v1158_v15 = vmax.f32 %v1094_v5, 0.0  ;;  %v1705_v16 = vpack.c.bf16 %v1128_v6, %v1127_v2  ;;  %v1785_v17 = vpack.c.bf16 %v1160_v7, %v1159_v3 }
 0x109   :  { %v994_v18 = vmul.f32 %v2180_v40, %v549_v10  ;;  %v1026_v19 = vmul.f32 %v2180_v40, %v677_v11  ;;  %v1951_v20 = vpop.f32.mrf.mxu0  ;;  %v1983_v21 = vpop.f32.mrf.mxu1  ;;  %v1067_v24 = vadd.f32 %v2187_v45, %v996_v8  ;;  %v1099_v25 = vadd.f32 %v2187_v45, %v1028_v9 }
 0x10a   :  { %v1700_v22 = vpack.c.bf16 %v1126_v14, %v1125_v12  ;;  %v1780_v23 = vpack.c.bf16 %v1158_v15, %v1157_v13  ;;  %1857 = vst [vmem:[#allocation8 + $0x8] sm:$0xff] %v1705_v16   ;;  %1873 = vst [vmem:[#allocation8 + $0x88] sm:$0xff] %v1785_v17   ;;  %v997_v26 = vmul.f32 %v1951_v20, %v2180_v40 }
 0x10b   :  { %v1029_v27 = vmul.f32 %v1983_v21, %v2180_v40  ;;  %v552_v28 = vpop.f32.mrf.mxu0  ;;  %v680_v29 = vpop.f32.mrf.mxu1  ;;  %v1065_v30 = vadd.f32 %v2187_v45, %v994_v18  ;;  %v1097_v31 = vadd.f32 %v2187_v45, %v1026_v19  ;;  %v1131_v43 = vmax.f32 %v1067_v24, 0.0 }
 0x10c   :  { %1701 = vst [vmem:[#allocation8] sm:$0xff] %v1700_v22   ;;  %1872 = vst [vmem:[#allocation8 + $0x80] sm:$0xff] %v1780_v23   ;;  %v995_v32 = vmul.f32 %v2180_v40, %v552_v28  ;;  %v1027_v33 = vmul.f32 %v2180_v40, %v680_v29  ;;  %v1068_v34 = vadd.f32 %v2187_v45, %v997_v26  ;;  %v1163_v44 = vmax.f32 %v1099_v25, 0.0 }
 0x10d   :  { %v1100_v35 = vadd.f32 %v2187_v45, %v1029_v27  ;;  %v1954_v36 = vpop.f32.mrf.mxu0  ;;  %v1986_v37 = vpop.f32.mrf.mxu1  ;;  %v1129_v50 = vmax.f32 %v1065_v30, 0.0  ;;  %v1161_v51 = vmax.f32 %v1097_v31, 0.0 }
 0x10e   :  { %v1066_v38 = vadd.f32 %v2187_v45, %v995_v32  ;;  %v1098_v39 = vadd.f32 %v2187_v45, %v1027_v33  ;;  %v1000_v41 = vmul.f32 %v1954_v36, %v2180_v40  ;;  %v1032_v42 = vmul.f32 %v1986_v37, %v2180_v40 }
 0x10f   :  { %v1132_v46 = vmax.f32 %v1068_v34, 0.0  ;;  %v1164_v47 = vmax.f32 %v1100_v35, 0.0  ;;  %v565_v48 = vpop.f32.mrf.mxu0  ;;  %v693_v49 = vpop.f32.mrf.mxu1 }
 0x110   :  { %v1130_v52 = vmax.f32 %v1066_v38, 0.0  ;;  %v1162_v53 = vmax.f32 %v1098_v39, 0.0  ;;  %v998_v56 = vmul.f32 %v2180_v40, %v565_v48  ;;  %v1030_v57 = vmul.f32 %v2180_v40, %v693_v49 }
 0x111   :  { %v1715_v54 = vpack.c.bf16 %v1132_v46, %v1131_v43  ;;  %v1795_v55 = vpack.c.bf16 %v1164_v47, %v1163_v44  ;;  %v1955_v58 = vpop.f32.mrf.mxu0  ;;  %v1987_v59 = vpop.f32.mrf.mxu1  ;;  %v1071_v62 = vadd.f32 %v2187_v45, %v1000_v41  ;;  %v1103_v63 = vadd.f32 %v2187_v45, %v1032_v42 }
 0x112   :  { %v1710_v60 = vpack.c.bf16 %v1130_v52, %v1129_v50  ;;  %v1790_v61 = vpack.c.bf16 %v1162_v53, %v1161_v51  ;;  %v1001_v0 = vmul.f32 %v1955_v58, %v2180_v40  ;;  %v1033_v1 = vmul.f32 %v1987_v59, %v2180_v40 }
 0x113   :  { %1859 = vst [vmem:[#allocation8 + $0x18] sm:$0xff] %v1715_v54   ;;  %1875 = vst [vmem:[#allocation8 + $0x98] sm:$0xff] %v1795_v55   ;;  %v568_v2 = vpop.f32.mrf.mxu0  ;;  %v696_v3 = vpop.f32.mrf.mxu1  ;;  %v1069_v4 = vadd.f32 %v2187_v45, %v998_v56  ;;  %v1101_v5 = vadd.f32 %v2187_v45, %v1030_v57  ;;  %v1135_v12 = vmax.f32 %v1071_v62, 0.0  ;;  %v1167_v13 = vmax.f32 %v1103_v63, 0.0 }
 0x114   :  { %1858 = vst [vmem:[#allocation8 + $0x10] sm:$0xff] %v1710_v60   ;;  %1874 = vst [vmem:[#allocation8 + $0x90] sm:$0xff] %v1790_v61   ;;  %v999_v6 = vmul.f32 %v2180_v40, %v568_v2  ;;  %v1031_v7 = vmul.f32 %v2180_v40, %v696_v3  ;;  %v1072_v8 = vadd.f32 %v2187_v45, %v1001_v0 }
 0x115   :  { %v1104_v9 = vadd.f32 %v2187_v45, %v1033_v1  ;;  %v1958_v10 = vpop.f32.mrf.mxu0  ;;  %v1990_v11 = vpop.f32.mrf.mxu1  ;;  %v1133_v22 = vmax.f32 %v1069_v4, 0.0  ;;  %v1165_v23 = vmax.f32 %v1101_v5, 0.0 }
 0x116   :  { %v1070_v14 = vadd.f32 %v2187_v45, %v999_v6  ;;  %v1102_v15 = vadd.f32 %v2187_v45, %v1031_v7  ;;  %v1136_v16 = vmax.f32 %v1072_v8, 0.0  ;;  %v1004_v18 = vmul.f32 %v1958_v10, %v2180_v40 }
 0x117   :  { %v1168_v17 = vmax.f32 %v1104_v9, 0.0  ;;  %v1036_v19 = vmul.f32 %v1990_v11, %v2180_v40  ;;  %v581_v20 = vpop.f32.mrf.mxu0  ;;  %v709_v21 = vpop.f32.mrf.mxu1 }
 0x118   :  { %v1134_v24 = vmax.f32 %v1070_v14, 0.0  ;;  %v1166_v25 = vmax.f32 %v1102_v15, 0.0  ;;  %v1725_v26 = vpack.c.bf16 %v1136_v16, %v1135_v12  ;;  %v1002_v28 = vmul.f32 %v2180_v40, %v581_v20 }
 0x119   :  { %v1805_v27 = vpack.c.bf16 %v1168_v17, %v1167_v13  ;;  %v1034_v29 = vmul.f32 %v2180_v40, %v709_v21  ;;  %v1959_v30 = vpop.f32.mrf.mxu0  ;;  %v1991_v31 = vpop.f32.mrf.mxu1  ;;  %v1075_v34 = vadd.f32 %v2187_v45, %v1004_v18  ;;  %v1107_v35 = vadd.f32 %v2187_v45, %v1036_v19 }
 0x11a   :  { %v1720_v32 = vpack.c.bf16 %v1134_v24, %v1133_v22  ;;  %v1800_v33 = vpack.c.bf16 %v1166_v25, %v1165_v23  ;;  %1861 = vst [vmem:[#allocation8 + $0x28] sm:$0xff] %v1725_v26   ;;  %v1005_v36 = vmul.f32 %v1959_v30, %v2180_v40  ;;  %v1037_v37 = vmul.f32 %v1991_v31, %v2180_v40 }
 0x11b   :  { %1877 = vst [vmem:[#allocation8 + $0xa8] sm:$0xff] %v1805_v27   ;;  %v584_v38 = vpop.f32.mrf.mxu0  ;;  %v712_v39 = vpop.f32.mrf.mxu1  ;;  %v1073_v41 = vadd.f32 %v2187_v45, %v1002_v28  ;;  %v1105_v42 = vadd.f32 %v2187_v45, %v1034_v29  ;;  %v1139_v54 = vmax.f32 %v1075_v34, 0.0  ;;  %v1171_v55 = vmax.f32 %v1107_v35, 0.0 }
 0x11c   :  { %1860 = vst [vmem:[#allocation8 + $0x20] sm:$0xff] %v1720_v32   ;;  %1876 = vst [vmem:[#allocation8 + $0xa0] sm:$0xff] %v1800_v33   ;;  %v1003_v43 = vmul.f32 %v2180_v40, %v584_v38  ;;  %v1035_v44 = vmul.f32 %v2180_v40, %v712_v39  ;;  %v1076_v46 = vadd.f32 %v2187_v45, %v1005_v36 }
 0x11d   :  { %v1108_v47 = vadd.f32 %v2187_v45, %v1037_v37  ;;  %v1962_v48 = vpop.f32.mrf.mxu0  ;;  %v1994_v49 = vpop.f32.mrf.mxu1  ;;  %v1137_v60 = vmax.f32 %v1073_v41, 0.0  ;;  %v1169_v61 = vmax.f32 %v1105_v42, 0.0 }
 0x11e   :  { %v1074_v50 = vadd.f32 %v2187_v45, %v1003_v43  ;;  %v1106_v51 = vadd.f32 %v2187_v45, %v1035_v44  ;;  %v1008_v52 = vmul.f32 %v1962_v48, %v2180_v40  ;;  %v1040_v53 = vmul.f32 %v1994_v49, %v2180_v40 }
 0x11f   :  { %v1140_v56 = vmax.f32 %v1076_v46, 0.0  ;;  %v1172_v57 = vmax.f32 %v1108_v47, 0.0  ;;  %v597_v58 = vpop.f32.mrf.mxu0  ;;  %v725_v59 = vpop.f32.mrf.mxu1 }
 0x120   :  { %v1138_v62 = vmax.f32 %v1074_v50, 0.0  ;;  %v1170_v63 = vmax.f32 %v1106_v51, 0.0  ;;  %v1006_v2 = vmul.f32 %v2180_v40, %v597_v58  ;;  %v1038_v3 = vmul.f32 %v2180_v40, %v725_v59 }
 0x121   :  { %v1735_v0 = vpack.c.bf16 %v1140_v56, %v1139_v54  ;;  %v1815_v1 = vpack.c.bf16 %v1172_v57, %v1171_v55  ;;  %v1963_v4 = vpop.f32.mrf.mxu0  ;;  %v1995_v5 = vpop.f32.mrf.mxu1  ;;  %v1079_v8 = vadd.f32 %v2187_v45, %v1008_v52  ;;  %v1111_v9 = vadd.f32 %v2187_v45, %v1040_v53 }
 0x122   :  { %v1730_v6 = vpack.c.bf16 %v1138_v62, %v1137_v60  ;;  %v1810_v7 = vpack.c.bf16 %v1170_v63, %v1169_v61  ;;  %v1009_v10 = vmul.f32 %v1963_v4, %v2180_v40  ;;  %v1041_v11 = vmul.f32 %v1995_v5, %v2180_v40 }
 0x123   :  { %1863 = vst [vmem:[#allocation8 + $0x38] sm:$0xff] %v1735_v0   ;;  %1879 = vst [vmem:[#allocation8 + $0xb8] sm:$0xff] %v1815_v1   ;;  %v600_v12 = vpop.f32.mrf.mxu0  ;;  %v728_v13 = vpop.f32.mrf.mxu1  ;;  %v1077_v14 = vadd.f32 %v2187_v45, %v1006_v2  ;;  %v1109_v15 = vadd.f32 %v2187_v45, %v1038_v3  ;;  %v1143_v22 = vmax.f32 %v1079_v8, 0.0  ;;  %v1175_v23 = vmax.f32 %v1111_v9, 0.0 }
 0x124   :  { %1862 = vst [vmem:[#allocation8 + $0x30] sm:$0xff] %v1730_v6   ;;  %1878 = vst [vmem:[#allocation8 + $0xb0] sm:$0xff] %v1810_v7   ;;  %v1007_v16 = vmul.f32 %v2180_v40, %v600_v12  ;;  %v1039_v17 = vmul.f32 %v2180_v40, %v728_v13  ;;  %v1080_v18 = vadd.f32 %v2187_v45, %v1009_v10 }
 0x125   :  { %v1112_v19 = vadd.f32 %v2187_v45, %v1041_v11  ;;  %v1966_v20 = vpop.f32.mrf.mxu0  ;;  %v1998_v21 = vpop.f32.mrf.mxu1  ;;  %v1141_v32 = vmax.f32 %v1077_v14, 0.0  ;;  %v1173_v33 = vmax.f32 %v1109_v15, 0.0 }
 0x126   :  { %v1078_v24 = vadd.f32 %v2187_v45, %v1007_v16  ;;  %v1110_v25 = vadd.f32 %v2187_v45, %v1039_v17  ;;  %v1144_v26 = vmax.f32 %v1080_v18, 0.0  ;;  %v1012_v28 = vmul.f32 %v1966_v20, %v2180_v40 }
 0x127   :  { %v1176_v27 = vmax.f32 %v1112_v19, 0.0  ;;  %v1044_v29 = vmul.f32 %v1998_v21, %v2180_v40  ;;  %v613_v30 = vpop.f32.mrf.mxu0  ;;  %v741_v31 = vpop.f32.mrf.mxu1 }
 0x128   :  { %v1142_v34 = vmax.f32 %v1078_v24, 0.0  ;;  %v1174_v35 = vmax.f32 %v1110_v25, 0.0  ;;  %v1745_v36 = vpack.c.bf16 %v1144_v26, %v1143_v22  ;;  %v1010_v38 = vmul.f32 %v2180_v40, %v613_v30 }
 0x129   :  { %v1825_v37 = vpack.c.bf16 %v1176_v27, %v1175_v23  ;;  %v1042_v39 = vmul.f32 %v2180_v40, %v741_v31  ;;  %v1967_v41 = vpop.f32.mrf.mxu0  ;;  %v1999_v42 = vpop.f32.mrf.mxu1  ;;  %v1083_v46 = vadd.f32 %v2187_v45, %v1012_v28  ;;  %v1115_v47 = vadd.f32 %v2187_v45, %v1044_v29 }
 0x12a   :  { %v1740_v43 = vpack.c.bf16 %v1142_v34, %v1141_v32  ;;  %v1820_v44 = vpack.c.bf16 %v1174_v35, %v1173_v33  ;;  %1865 = vst [vmem:[#allocation8 + $0x48] sm:$0xff] %v1745_v36   ;;  %v1013_v48 = vmul.f32 %v1967_v41, %v2180_v40  ;;  %v1045_v49 = vmul.f32 %v1999_v42, %v2180_v40 }
 0x12b   :  { %1881 = vst [vmem:[#allocation8 + $0xc8] sm:$0xff] %v1825_v37   ;;  %v616_v50 = vpop.f32.mrf.mxu0  ;;  %v744_v51 = vpop.f32.mrf.mxu1  ;;  %v1081_v52 = vadd.f32 %v2187_v45, %v1010_v38  ;;  %v1113_v53 = vadd.f32 %v2187_v45, %v1042_v39  ;;  %v1147_v0 = vmax.f32 %v1083_v46, 0.0  ;;  %v1179_v1 = vmax.f32 %v1115_v47, 0.0 }
 0x12c   :  { %1864 = vst [vmem:[#allocation8 + $0x40] sm:$0xff] %v1740_v43   ;;  %1880 = vst [vmem:[#allocation8 + $0xc0] sm:$0xff] %v1820_v44   ;;  %v1011_v54 = vmul.f32 %v2180_v40, %v616_v50  ;;  %v1043_v55 = vmul.f32 %v2180_v40, %v744_v51  ;;  %v1084_v56 = vadd.f32 %v2187_v45, %v1013_v48 }
 0x12d   :  { %v1116_v57 = vadd.f32 %v2187_v45, %v1045_v49  ;;  %v1970_v58 = vpop.f32.mrf.mxu0  ;;  %v2002_v59 = vpop.f32.mrf.mxu1  ;;  %v1145_v6 = vmax.f32 %v1081_v52, 0.0  ;;  %v1177_v7 = vmax.f32 %v1113_v53, 0.0 }
 0x12e   :  { %v1082_v60 = vadd.f32 %v2187_v45, %v1011_v54  ;;  %v1114_v61 = vadd.f32 %v2187_v45, %v1043_v55  ;;  %v1016_v62 = vmul.f32 %v1970_v58, %v2180_v40  ;;  %v1048_v63 = vmul.f32 %v2002_v59, %v2180_v40 }
 0x12f   :  { %v1148_v2 = vmax.f32 %v1084_v56, 0.0  ;;  %v1180_v3 = vmax.f32 %v1116_v57, 0.0  ;;  %v629_v4 = vpop.f32.mrf.mxu0  ;;  %v757_v5 = vpop.f32.mrf.mxu1 }
 0x130   :  { %v1146_v8 = vmax.f32 %v1082_v60, 0.0  ;;  %v1178_v9 = vmax.f32 %v1114_v61, 0.0  ;;  %v1014_v12 = vmul.f32 %v2180_v40, %v629_v4  ;;  %v1046_v13 = vmul.f32 %v2180_v40, %v757_v5 }
 0x131   :  { %v1755_v10 = vpack.c.bf16 %v1148_v2, %v1147_v0  ;;  %v1835_v11 = vpack.c.bf16 %v1180_v3, %v1179_v1  ;;  %v1971_v14 = vpop.f32.mrf.mxu0  ;;  %v2003_v15 = vpop.f32.mrf.mxu1  ;;  %v1087_v18 = vadd.f32 %v2187_v45, %v1016_v62  ;;  %v1119_v19 = vadd.f32 %v2187_v45, %v1048_v63 }
 0x132   :  { %v1750_v16 = vpack.c.bf16 %v1146_v8, %v1145_v6  ;;  %v1830_v17 = vpack.c.bf16 %v1178_v9, %v1177_v7  ;;  %v1017_v20 = vmul.f32 %v1971_v14, %v2180_v40  ;;  %v1049_v21 = vmul.f32 %v2003_v15, %v2180_v40 }
 0x133   :  { %1867 = vst [vmem:[#allocation8 + $0x58] sm:$0xff] %v1755_v10   ;;  %1883 = vst [vmem:[#allocation8 + $0xd8] sm:$0xff] %v1835_v11   ;;  %v632_v22 = vpop.f32.mrf.mxu0  ;;  %v760_v23 = vpop.f32.mrf.mxu1  ;;  %v1085_v24 = vadd.f32 %v2187_v45, %v1014_v12  ;;  %v1117_v25 = vadd.f32 %v2187_v45, %v1046_v13  ;;  %v1151_v32 = vmax.f32 %v1087_v18, 0.0  ;;  %v1183_v33 = vmax.f32 %v1119_v19, 0.0 }
 0x134   :  { %1866 = vst [vmem:[#allocation8 + $0x50] sm:$0xff] %v1750_v16   ;;  %1882 = vst [vmem:[#allocation8 + $0xd0] sm:$0xff] %v1830_v17   ;;  %v1015_v26 = vmul.f32 %v2180_v40, %v632_v22  ;;  %v1047_v27 = vmul.f32 %v2180_v40, %v760_v23  ;;  %v1088_v28 = vadd.f32 %v2187_v45, %v1017_v20 }
 0x135   :  { %v1120_v29 = vadd.f32 %v2187_v45, %v1049_v21  ;;  %v1974_v30 = vpop.f32.mrf.mxu0  ;;  %v2006_v31 = vpop.f32.mrf.mxu1  ;;  %v1149_v43 = vmax.f32 %v1085_v24, 0.0  ;;  %v1181_v44 = vmax.f32 %v1117_v25, 0.0 }
 0x136   :  { %v1086_v34 = vadd.f32 %v2187_v45, %v1015_v26  ;;  %v1118_v35 = vadd.f32 %v2187_v45, %v1047_v27  ;;  %v1152_v36 = vmax.f32 %v1088_v28, 0.0  ;;  %v1020_v38 = vmul.f32 %v1974_v30, %v2180_v40 }
 0x137   :  { %v1184_v37 = vmax.f32 %v1120_v29, 0.0  ;;  %v1052_v39 = vmul.f32 %v2006_v31, %v2180_v40  ;;  %v645_v41 = vpop.f32.mrf.mxu0  ;;  %v773_v42 = vpop.f32.mrf.mxu1 }
 0x138   :  { %v1150_v46 = vmax.f32 %v1086_v34, 0.0  ;;  %v1182_v47 = vmax.f32 %v1118_v35, 0.0  ;;  %v1765_v48 = vpack.c.bf16 %v1152_v36, %v1151_v32  ;;  %v1018_v50 = vmul.f32 %v2180_v40, %v645_v41 }
 0x139   :  { %v1845_v49 = vpack.c.bf16 %v1184_v37, %v1183_v33  ;;  %v1050_v51 = vmul.f32 %v2180_v40, %v773_v42  ;;  %v1975_v52 = vpop.f32.mrf.mxu0  ;;  %v2007_v53 = vpop.f32.mrf.mxu1  ;;  %v1091_v56 = vadd.f32 %v2187_v45, %v1020_v38  ;;  %v1123_v57 = vadd.f32 %v2187_v45, %v1052_v39 }
 0x13a   :  { %v1760_v54 = vpack.c.bf16 %v1150_v46, %v1149_v43  ;;  %v1840_v55 = vpack.c.bf16 %v1182_v47, %v1181_v44  ;;  %1869 = vst [vmem:[#allocation8 + $0x68] sm:$0xff] %v1765_v48   ;;  %v1021_v58 = vmul.f32 %v1975_v52, %v2180_v40  ;;  %v1053_v59 = vmul.f32 %v2007_v53, %v2180_v40 }
 0x13b   :  { %1885 = vst [vmem:[#allocation8 + $0xe8] sm:$0xff] %v1845_v49   ;;  %v648_v60 = vpop.f32.mrf.mxu0  ;;  %v776_v61 = vpop.f32.mrf.mxu1  ;;  %v1089_v62 = vadd.f32 %v2187_v45, %v1018_v50  ;;  %v1121_v63 = vadd.f32 %v2187_v45, %v1050_v51  ;;  %v1155_v6 = vmax.f32 %v1091_v56, 0.0  ;;  %v1187_v7 = vmax.f32 %v1123_v57, 0.0 }
 0x13c   :  { %1868 = vst [vmem:[#allocation8 + $0x60] sm:$0xff] %v1760_v54   ;;  %1884 = vst [vmem:[#allocation8 + $0xe0] sm:$0xff] %v1840_v55   ;;  %v1019_v0 = vmul.f32 %v2180_v40, %v648_v60  ;;  %v1051_v1 = vmul.f32 %v2180_v40, %v776_v61  ;;  %v1092_v2 = vadd.f32 %v2187_v45, %v1021_v58 }
 0x13d   :  { %v1124_v3 = vadd.f32 %v2187_v45, %v1053_v59  ;;  %v1153_v10 = vmax.f32 %v1089_v62, 0.0  ;;  %v1185_v11 = vmax.f32 %v1121_v63, 0.0 }
 0x13e   :  { %v1090_v4 = vadd.f32 %v2187_v45, %v1019_v0  ;;  %v1122_v5 = vadd.f32 %v2187_v45, %v1051_v1  ;;  %v1156_v8 = vmax.f32 %v1092_v2, 0.0 }
 0x13f   :  { %v1188_v9 = vmax.f32 %v1124_v3, 0.0 }
 0x140   :  { %v1154_v12 = vmax.f32 %v1090_v4, 0.0  ;;  %v1186_v13 = vmax.f32 %v1122_v5, 0.0  ;;  %v1775_v14 = vpack.c.bf16 %v1156_v8, %v1155_v6 }
 0x141   :  { %v1855_v40 = vpack.c.bf16 %v1188_v9, %v1187_v7 }
 0x142   :  { %v1770_v15 = vpack.c.bf16 %v1154_v12, %v1153_v10  ;;  %v1850_v16 = vpack.c.bf16 %v1186_v13, %v1185_v11  ;;  %1871 = vst [vmem:[#allocation8 + $0x78] sm:$0xff] %v1775_v14  }
 0x143   :  { %1887 = vst [vmem:[#allocation8 + $0xf8] sm:$0xff] %v1855_v40  }
 0x144   :  { %1870 = vst [vmem:[#allocation8 + $0x70] sm:$0xff] %v1770_v15   ;;  %1886 = vst [vmem:[#allocation8 + $0xf0] sm:$0xff] %v1850_v16  }
 0x145   :  { %2120 = shalt.err (!%p2117_p0)
}
 0x146   :  { %1520 = dma.vmem_to_hbm [thread:$0]  %s1515_s3, 4096, %s2325_s4, [#allocation5], %s2136_s18, %s2136_s18, %s2137_s19  }
 0x147   :  { %2133 = dma.done.wait [#allocation5], 4096  }
 0x148   :  { %2134 = vsyncadd [#allocation5], 4294963200 }
 0x149   :  { %1524 = vsyncpa [#allocation4], 1 }
 0x14a   :  { %1525 = vsyncpa [#allocation7], 1 }
 0x14b   :  { %1526 = vsyncpa [#allocation5], 1 }

</bundles_post_ra>
